<compile_context>
chip_gen: v7x
topology: tpu7x:2x2x1
jax: 0.10.0
libtpu: 0.0.40
codegen_flags: <defaults>
</compile_context>

<pallas_src>
import jax
import jax.numpy as jnp
from jax.experimental import pallas as pl
from jax.experimental.pallas import tpu as pltpu

_CHUNK = 8  # sublane chunk size for the in-kernel channel reduction


def channel_mix_kernel(x_ref, wt_ref, b_ref, o_ref, acc_ref):
    # x_ref  : (TB, TC, TD) VMEM  input tile
    # wt_ref : (TC, TD)     VMEM  chan_mix.T tile
    # b_ref  : (1, TD)      VMEM  bias tile
    # o_ref  : (TB, TD)     VMEM  output tile (same block across the C axis)
    # acc_ref: (TB, TD)     VMEM  f32 scratch accumulator
    k = pl.program_id(2)

    @pl.when(k == 0)
    def _():
        acc_ref[...] = jnp.zeros_like(acc_ref)

    tc = x_ref.shape[1]  # static channel-tile size
    acc = acc_ref[...]   # single load; accumulate in registers below

    n_full = (tc // _CHUNK) * _CHUNK
    # 8-sublane chunks: f32 multiply (VPU) + sublane reduction (XLU).
    for c0 in range(0, n_full, _CHUNK):
        xc = x_ref[:, c0:c0 + _CHUNK, :].astype(jnp.float32)   # (TB, 8, TD)
        wc = wt_ref[c0:c0 + _CHUNK, :].astype(jnp.float32)     # (8, TD)
        acc = acc + jnp.sum(xc * wc[None, :, :], axis=1)
    if n_full < tc:  # static remainder (< 8 channels)
        xc = x_ref[:, n_full:tc, :].astype(jnp.float32)
        wc = wt_ref[n_full:tc, :].astype(jnp.float32)
        acc = acc + jnp.sum(xc * wc[None, :, :], axis=1)

    acc_ref[...] = acc  # single store per grid step

    @pl.when(k == pl.num_programs(2) - 1)
    def _():
        o_ref[...] = (acc_ref[...] + b_ref[...].astype(jnp.float32)).astype(o_ref.dtype)


def _vmem_capacity_bytes():
    try:
        return int(pltpu.get_tpu_info().vmem_capacity_bytes)
    except Exception:
        return 64 * 1024 * 1024  # conservative: v7x has 64 MiB per TensorCore


def _descending_divisors(full, candidates, align):
    """Full extent first (contiguous DMA), then aligned divisors, descending."""
    out = [full]
    for t in candidates:
        if t < full and full % t == 0 and t % align == 0:
            out.append(t)
    return out


def _choose_tiles(B, C, D, x_itemsize, w_itemsize, budget):
    # Sublane alignment scales with dtype packing (f32->8, bf16->16, int8->32)
    # so output / x blocks are whole packed vreg tiles (no masked vst).
    pack = max(1, 4 // max(1, x_itemsize))
    align = 8 * pack

    d_cands = _descending_divisors(D, (8192, 4096, 2048, 1024, 512, 256, 128), 128)
    b_cands = _descending_divisors(
        B, (4096, 2048, 1024, 512, 256, 128, 64, 32, 16, 8), align)

    # Channel tile: full C when small; otherwise cap at 256 so the in-kernel
    # chunk loop stays a short static unroll — remaining C comes from the
    # "arbitrary" grid axis.
    if C <= 256:
        c_cands = [C]
    else:
        c_cands = [t for t in (256, 128, 64, 32, 16, 8)
                   if C % t == 0 and t % align == 0]
        if not c_cands:
            c_cands = [C]  # TODO(synk): pad C when it has no aligned divisor

    def footprint(tb, tc, td):
        x_b = 2 * tb * tc * td * x_itemsize      # double-buffered input
        w_b = 2 * tc * td * w_itemsize           # double-buffered weight (f32)
        bias_b = 2 * td * w_itemsize             # double-buffered bias
        o_b = 2 * tb * td * x_itemsize           # double-buffered output
        acc_b = tb * td * 4                      # f32 scratch accumulator
        return x_b + w_b + bias_b + o_b + acc_b

    # Preference: keep td = D and tb large; shrink the channel tile first
    # (only adds cheap C-grid steps), then the batch tile, lane tile last.
    for td in d_cands:
        for tb in b_cands:
            for tc in c_cands:
                if footprint(tb, tc, td) <= budget:
                    return tb, tc, td, footprint(tb, tc, td)
    tb, tc, td = b_cands[-1], c_cands[-1], d_cands[-1]
    return tb, tc, td, footprint(tb, tc, td)


def channel_mix(x, chan_mix, bias):
    """x: (B, C, D), chan_mix: (D, C), bias: (D,) -> (B, D).

    out[b, d] = sum_c x[b, c, d] * chan_mix[d, c] + bias[d]
    """
    B, C, D = x.shape
    wt = jnp.asarray(chan_mix).T             # (C, D) == chan_mix.T in the module
    b2 = jnp.asarray(bias).reshape(1, D)     # 2-D for TPU lane layout

    x_item = jnp.dtype(x.dtype).itemsize
    w_item = jnp.dtype(wt.dtype).itemsize

    cap = _vmem_capacity_bytes()
    budget = (cap * 3) // 5                  # ~60% of physical VMEM
    tb, tc, td, fp = _choose_tiles(B, C, D, x_item, w_item, budget)
    vmem_limit = int(min(cap, max((cap * 3) // 4, fp + (2 << 20))))

    gd, gb, gc = D // td, B // tb, C // tc

    # Larger parallel axis first (even megacore split on v7x); reduction last.
    if gd >= gb:
        grid = (gd, gb, gc)
        x_map = lambda j, i, k: (i, k, j)
        w_map = lambda j, i, k: (k, j)      # ignores the batch axis -> resident
        bias_map = lambda j, i, k: (0, j)
        o_map = lambda j, i, k: (i, j)
    else:
        grid = (gb, gd, gc)
        x_map = lambda i, j, k: (i, k, j)
        w_map = lambda i, j, k: (k, j)
        bias_map = lambda i, j, k: (0, j)
        o_map = lambda i, j, k: (i, j)

    cost = pl.CostEstimate(
        flops=2 * B * C * D,
        transcendentals=0,
        bytes_accessed=x_item * (B * C * D + B * D) + w_item * (C * D + D),
    )

    return pl.pallas_call(
        channel_mix_kernel,
        out_shape=jax.ShapeDtypeStruct((B, D), x.dtype),
        grid_spec=pltpu.PrefetchScalarGridSpec(
            num_scalar_prefetch=0,
            grid=grid,
            in_specs=[
                pl.BlockSpec((tb, tc, td), x_map),
                pl.BlockSpec((tc, td), w_map),
                pl.BlockSpec((1, td), bias_map),
            ],
            out_specs=pl.BlockSpec((tb, td), o_map),
            scratch_shapes=[pltpu.VMEM((tb, td), jnp.float32)],
        ),
        compiler_params=pltpu.CompilerParams(
            dimension_semantics=("parallel", "parallel", "arbitrary"),
            vmem_limit_bytes=vmem_limit,
        ),
        cost_estimate=cost,
    )(x, wt, b2)


def init_params(key, n_chan, out_dim):
    # xavier_normal_ on (out_dim, n_chan): std = sqrt(2 / (fan_in + fan_out))
    std = (2.0 / (n_chan + out_dim)) ** 0.5
    chan_mix = std * jax.random.normal(key, (out_dim, n_chan), jnp.float32)
    bias = jnp.full((out_dim,), 0.01, jnp.float32)
    return chan_mix, bias


if __name__ == "__main__":
    key = jax.random.PRNGKey(0)
    k_x, k_w = jax.random.split(key)

    B, n_chan, out_dim = 2, 4, 16
    x = jax.random.normal(k_x, (B, n_chan, out_dim), jnp.float32)
    chan_mix, bias = init_params(k_w, n_chan, out_dim)

    out = channel_mix(x, chan_mix, bias)
    out = jax.block_until_ready(out)

    # Reference (plain JAX) check of the exact PyTorch broadcast semantics.
    ref = (x * chan_mix.T).sum(-2) + bias
    assert out.shape == (B, out_dim)
    assert jnp.allclose(out, ref, atol=1e-5, rtol=1e-5)

    print("KERNEL_OK")
</pallas_src>

<mosaic_0001>
module attributes {stable_mosaic.version = 11 : i64} {
  func.func @channel_mix_kernel(%arg0: i32, %arg1: i32, %arg2: i32, %arg3: memref<2x4x16xf32, #tpu.memory_space<vmem>>, %arg4: memref<4x16xf32, #tpu.memory_space<vmem>>, %arg5: memref<1x16xf32, #tpu.memory_space<vmem>>, %arg6: memref<2x16xf32, #tpu.memory_space<vmem>>, %arg7: memref<2x16xf32, #tpu.memory_space<vmem>>) attributes {dimension_semantics = [#tpu.dimension_semantics<parallel>, #tpu.dimension_semantics<parallel>, #tpu.dimension_semantics<arbitrary>], iteration_bounds = array<i64: 1, 1, 1>, scalar_prefetch = 0 : i64, scratch_operands = 1 : i64, tpu.core_type = #tpu.core_type<tc>, window_params = [{transform_indices = @transform_0, window_bounds = array<i64: 2, 4, 16>}, {transform_indices = @transform_1, window_bounds = array<i64: 4, 16>}, {transform_indices = @transform_2, window_bounds = array<i64: 1, 16>}, {transform_indices = @transform_3, window_bounds = array<i64: 2, 16>}]} {
    %c0_i32 = arith.constant 0 : i32
    %0 = arith.cmpi eq, %arg2, %c0_i32 : i32
    %1 = arith.extui %0 : i1 to i32
    %c0_i32_0 = arith.constant 0 : i32
    %2 = arith.cmpi ne, %1, %c0_i32_0 : i32
    scf.if %2 {
      %cst_11 = arith.constant 0.000000e+00 : f32
      %15 = vector.broadcast %cst_11 : f32 to vector<2x16xf32>
      %c0_12 = arith.constant 0 : index
      %c0_13 = arith.constant 0 : index
      %16 = vector.load %arg7[%c0_12, %c0_13] : memref<2x16xf32, #tpu.memory_space<vmem>>, vector<2x16xf32>
      tpu.vector_store %arg7[%c0_12, %c0_13], %15 {strides = array<i32>} : memref<2x16xf32, #tpu.memory_space<vmem>>, vector<2x16xf32>,
    } else {
    }
    %c0 = arith.constant 0 : index
    %c0_1 = arith.constant 0 : index
    %3 = vector.load %arg7[%c0, %c0_1] : memref<2x16xf32, #tpu.memory_space<vmem>>, vector<2x16xf32>
    %c0_2 = arith.constant 0 : index
    %c0_3 = arith.constant 0 : index
    %c0_4 = arith.constant 0 : index
    %4 = vector.load %arg3[%c0_2, %c0_3, %c0_4] : memref<2x4x16xf32, #tpu.memory_space<vmem>>, vector<2x4x16xf32>
    %c0_5 = arith.constant 0 : index
    %c0_6 = arith.constant 0 : index
    %5 = vector.load %arg4[%c0_5, %c0_6] : memref<4x16xf32, #tpu.memory_space<vmem>>, vector<4x16xf32>
    %6 = vector.shape_cast %5 : vector<4x16xf32> to vector<1x4x16xf32>
    %7 = vector.broadcast %6 : vector<1x4x16xf32> to vector<2x4x16xf32>
    %8 = arith.mulf %4, %7 : vector<2x4x16xf32>
    %cst = arith.constant dense<0.000000e+00> : vector<2x16xf32>
    %9 = vector.multi_reduction <add>, %8, %cst [1] : vector<2x4x16xf32> to vector<2x16xf32>
    %10 = arith.addf %3, %9 : vector<2x16xf32>
    %c0_7 = arith.constant 0 : index
    %c0_8 = arith.constant 0 : index
    %11 = vector.load %arg7[%c0_7, %c0_8] : memref<2x16xf32, #tpu.memory_space<vmem>>, vector<2x16xf32>
    tpu.vector_store %arg7[%c0_7, %c0_8], %10 {strides = array<i32>} : memref<2x16xf32, #tpu.memory_space<vmem>>, vector<2x16xf32>,
    %c0_i32_9 = arith.constant 0 : i32
    %12 = arith.cmpi eq, %arg2, %c0_i32_9 : i32
    %13 = arith.extui %12 : i1 to i32
    %c0_i32_10 = arith.constant 0 : i32
    %14 = arith.cmpi ne, %13, %c0_i32_10 : i32
    scf.if %14 {
      %c0_11 = arith.constant 0 : index
      %c0_12 = arith.constant 0 : index
      %15 = vector.load %arg7[%c0_11, %c0_12] : memref<2x16xf32, #tpu.memory_space<vmem>>, vector<2x16xf32>
      %c0_13 = arith.constant 0 : index
      %c0_14 = arith.constant 0 : index
      %16 = vector.load %arg5[%c0_13, %c0_14] : memref<1x16xf32, #tpu.memory_space<vmem>>, vector<1x16xf32>
      %17 = vector.broadcast %16 : vector<1x16xf32> to vector<2x16xf32>
      %18 = arith.addf %15, %17 : vector<2x16xf32>
      %c0_15 = arith.constant 0 : index
      %c0_16 = arith.constant 0 : index
      %19 = vector.load %arg6[%c0_15, %c0_16] : memref<2x16xf32, #tpu.memory_space<vmem>>, vector<2x16xf32>
      tpu.vector_store %arg6[%c0_15, %c0_16], %18 {strides = array<i32>} : memref<2x16xf32, #tpu.memory_space<vmem>>, vector<2x16xf32>,
    } else {
    }
    return
  }
  func.func @transform_0(%arg0: i32, %arg1: i32, %arg2: i32) -> (i32, i32, i32) {
    %c0_i32 = arith.constant 0 : i32
    return %arg1, %arg2, %arg0 : i32, i32, i32
  }
  func.func @transform_1(%arg0: i32, %arg1: i32, %arg2: i32) -> (i32, i32) {
    %c0_i32 = arith.constant 0 : i32
    return %arg2, %arg0 : i32, i32
  }
  func.func @transform_2(%arg0: i32, %arg1: i32, %arg2: i32) -> (i32, i32) {
    %c0_i32 = arith.constant 0 : i32
    %c0_i32_0 = arith.constant 0 : i32
    return %c0_i32, %arg0 : i32, i32
  }
  func.func @transform_3(%arg0: i32, %arg1: i32, %arg2: i32) -> (i32, i32) {
    %c0_i32 = arith.constant 0 : i32
    return %arg1, %arg0 : i32, i32
  }
}

</mosaic_0001>

<bundles_post_ra>
// kernel: tpu_custom_call.1
= control target key start
LH: loop header
LB: loop body
LE: loop exit
PB: predicated region body
PF: predicated region fallthrough
CT: control target
= control target key end

     0   :  { %8 = vsyncpa [#allocation4], 0  ;;  %s252_s0 = inlined_call_operand.hbm [shape: f32[2,4,16], index: 0, kind: input, shape index: {}]   ;;  %s253_s1 = inlined_call_operand.hbm [shape: f32[4,16], index: 1, kind: input, shape index: {}]   ;;  %s254_s2 = inlined_call_operand.vmem [shape: f32[1,16], index: 2, kind: input, shape index: {}]   ;;  %s255_s3 = inlined_call_operand.hbm [shape: f32[2,16], index: 3, kind: output, shape index: {}]  }
   0x1   :  { %9 = vsyncpa [#allocation7], 0 }
   0x2   :  { %10 = vsyncpa [#allocation5], 0  ;;  %s184_s12 = smov [#allocation3]   ;;  %s112_s16 = scalar_lea.hbm %s252_s0, 128 }
   0x3   :  { %s16_s13 = sshll.u32 %s184_s12, 4  ;;  %p113_p0 = scmp.ne.s32.totalorder %s252_s0, %s112_s16  ;;  %s17_s13 = int_to_ptr.vmem [resolvable:$true] %s16_s13 }
   0x4   :  { %p116_p1 = scmp.lt.u32.totalorder %s112_s16, %s252_s0 }
   0x6   :  { %p118_p2 = pnand %p116_p1, %p113_p0 }
   0x8   :  { %121 = shalt.err (!%p118_p2)
}
   0x9   :  { %s122_s21 = scalar_lea.vmem %s17_s13, 128  ;;  %p127_p4 = scmp.lt.s32.totalorder %s17_s13, %s17_s13 }
   0xa   :  { %p123_p3 = scmp.ne.s32.totalorder %s17_s13, %s122_s21  ;;  %p128_p5 = scmp.lt.s32.totalorder %s122_s21, %s122_s21 }
   0xc   :  { %p129_p6 = por %p128_p5, %p127_p4 }
   0xe   :  { %p130_p7 = pnand %p129_p6, %p123_p3 }
  0x10   :  { %133 = shalt.err (!%p130_p7)
}
  0x11   :  { %s185_s22 = smov 64   ;;  %s186_s23 = smov 4  }
  0x12   :  { %22 = dma.hbm_to_vmem [thread:$0]  %s252_s0, 128, %s17_s13, [#allocation4], %s185_s22, %s185_s22, %s186_s23  }
  0x13   :  { %s187_s26 = smov [#allocation6]   ;;  %s134_s30 = scalar_lea.hbm %s253_s1, 64 }
  0x14   :  { %s29_s27 = sshll.u32 %s187_s26, 4  ;;  %p135_p8 = scmp.ne.s32.totalorder %s253_s1, %s134_s30  ;;  %s30_s27 = int_to_ptr.vmem [resolvable:$true] %s29_s27 }
  0x15   :  { %p138_p9 = scmp.lt.u32.totalorder %s134_s30, %s253_s1 }
  0x17   :  { %p140_p10 = pnand %p138_p9, %p135_p8 }
  0x19   :  { %143 = shalt.err (!%p140_p10)
}
  0x1a   :  { %s144_s8 = scalar_lea.vmem %s30_s27, 64  ;;  %p149_p12 = scmp.lt.s32.totalorder %s30_s27, %s30_s27 }
  0x1b   :  { %p145_p11 = scmp.ne.s32.totalorder %s30_s27, %s144_s8  ;;  %p150_p13 = scmp.lt.s32.totalorder %s144_s8, %s144_s8 }
  0x1d   :  { %p151_p0 = por %p150_p13, %p149_p12 }
  0x1f   :  { %p152_p1 = pnand %p151_p0, %p145_p11 }
  0x21   :  { %155 = shalt.err (!%p152_p1)
}
  0x22   :  { %32 = dma.hbm_to_vmem [thread:$0]  %s253_s1, 64, %s30_s27, [#allocation7]  }
  0x23   :  { %178 = dma.done.wait [#allocation4], 128  }
  0x24   :  { %179 = vsyncadd [#allocation4], 4294967168 }
  0x25   :  { %180 = dma.done.wait [#allocation7], 64  }
  0x26   :  { %181 = vsyncadd [#allocation7], 4294967232  ;;  %vm45_vm0 = vcmask 123904   ;;  %v188_v0 = vmov 0.0   ;;  %vm53_vm1 = vcmask 125952   ;;  %vm70_vm2 = vcmask 1041409  }
  0x27   :  { %46 = vst.msk [vmem:[#allocation2] sm:$0x3] %vm45_vm0, %v188_v0  ;;  %v48_v1 = vld [vmem:[#allocation3] sm:$0xf]  ;;  %v49_v2 = vld [vmem:[#allocation3 + $0x4] sm:$0xf] }
  0x28   :  { %v50_v3 = vld [vmem:[#allocation6] sm:$0xf]  ;;  %v105_v23 = vld [vmem:[%s254_s2] ss:$0 sm:$0xff]  ;;  %s189_s11 = smov [#allocation8]  }
  0x29   :  { %v51_v4 = vmul.f32 %v50_v3, %v48_v1  ;;  %v52_v5 = vmul.f32 %v50_v3, %v49_v2  ;;  %s95_s12 = sshll.u32 %s189_s11, 4  ;;  %s96_s12 = int_to_ptr.vmem [resolvable:$true] %s95_s12 }
  0x2a   :  { %s156_s13 = scalar_lea.vmem %s96_s12, 32  ;;  %p161_p3 = scmp.lt.s32.totalorder %s96_s12, %s96_s12 }
  0x2b   :  { %v54_v6 = vsel %vm53_vm1, %v51_v4, 0.0  ;;  %v61_v7 = vsel %vm53_vm1, %v52_v5, 0.0  ;;  %p157_p2 = scmp.ne.s32.totalorder %s96_s12, %s156_s13  ;;  %p162_p4 = scmp.lt.s32.totalorder %s156_s13, %s156_s13 }
  0x2c   :  { %v55_v8 = vrot.slane %v54_v6, 4  ;;  %v62_v9 = vrot.slane %v61_v7, 4 }
  0x2d   :  { %p163_p5 = por %p162_p4, %p161_p3 }
  0x2e   :  { %v56_v10 = vadd.f32 %v55_v8, %v54_v6  ;;  %v63_v11 = vadd.f32 %v62_v9, %v61_v7  ;;  %v47_v18 = vld [vmem:[#allocation2] sm:$0x3] }
  0x2f   :  { %p164_p6 = pnand %p163_p5, %p157_p2 }
  0x30   :  { %v57_v12 = vrot.slane %v56_v10, 2  ;;  %v64_v13 = vrot.slane %v63_v11, 2 }
  0x32   :  { %v58_v14 = vadd.f32 %v57_v12, %v56_v10  ;;  %v65_v15 = vadd.f32 %v64_v13, %v63_v11 }
  0x34   :  { %v59_v16 = vrot.slane %v58_v14, 1  ;;  %v66_v17 = vrot.slane %v65_v15, 1 }
  0x36   :  { %v60_v19 = vadd.f32 %v59_v16, %v58_v14  ;;  %v67_v20 = vadd.f32 %v66_v17, %v65_v15 }
  0x38   :  { %v71_v21 = vsel %vm70_vm2, %v67_v20, %v60_v19 }
  0x39   :  { %v73_v22 = vadd.f32 %v71_v21, %v47_v18 }
  0x3b   :  { %75 = vst.msk [vmem:[#allocation2] sm:$0x3] %vm45_vm0, %v73_v22 }
  0x42   :  { %v79_v24 = vld [vmem:[#allocation2] sm:$0x3] }
  0x43   :  { %v87_v25 = vadd.f32 %v105_v23, %v79_v24 }
  0x45   :  { %88 = vst.msk [vmem:[#allocation8] sm:$0x3] %vm45_vm0, %v87_v25 }
  0x46   :  { %167 = shalt.err (!%p164_p6)
}
  0x47   :  { %s168_s16 = scalar_lea.hbm %s255_s3, 32 }
  0x48   :  { %p169_p7 = scmp.ne.s32.totalorder %s255_s3, %s168_s16  ;;  %p172_p8 = scmp.lt.u32.totalorder %s168_s16, %s255_s3 }
  0x4a   :  { %p174_p9 = pnand %p172_p8, %p169_p7 }
  0x4c   :  { %177 = shalt.err (!%p174_p9)
}
  0x4d   :  { %98 = dma.vmem_to_hbm [thread:$0]  %s96_s12, 32, %s255_s3, [#allocation5]  }
  0x4e   :  { %182 = dma.done.wait [#allocation5], 32  }
  0x4f   :  { %183 = vsyncadd [#allocation5], 4294967264 }
  0x50   :  { %102 = vsyncpa [#allocation4], 1 }
  0x51   :  { %103 = vsyncpa [#allocation7], 1 }
  0x52   :  { %104 = vsyncpa [#allocation5], 1 }

</bundles_post_ra>
